<compile_context>
chip_gen: v6e
topology: v6e:2x2x1
jax: 0.10.0
libtpu: 0.0.40
codegen_flags: <defaults>
</compile_context>

<pallas_src>
import numpy as np
import jax
import jax.numpy as jnp
from jax.experimental import pallas as pl
from jax.experimental.pallas import tpu as pltpu


def _round_up(x: int, m: int) -> int:
    return ((x + m - 1) // m) * m


def gmf_kernel(u_idx_ref, i_idx_ref, user_tab_ref, item_tab_ref, out_ref):
    """One grid step: TB_R lane-packed output rows (= P * TB_R batch rows).

    For each packed position q (static, unrolled):
      * build a (TB_R, num_rows) one-hot from the q-th index column
        (single compare -> single cast, no zeros/add chain),
      * gather the embedding rows with an exact 0/1 matmul on the MXU against
        the original (unpacked) table, accumulating in f32,
      * form the GMF product in f32.
    The P (TB_R, D) products are lane-concatenated (XLU slot, overlaps the
    MXU) into one (TB_R, P*D) slab so the store is lane-dense and unmasked.
    """
    u_idx = u_idx_ref[...]                      # (TB_R, P) int32
    i_idx = i_idx_ref[...]                      # (TB_R, P) int32
    user_tab = user_tab_ref[...]                # (num_users, D)
    item_tab = item_tab_ref[...]                # (num_items, D)

    tb_r, p = u_idx.shape
    nu = user_tab.shape[0]
    ni = item_tab.shape[0]

    # Hoisted iotas, shared by all packed positions.
    col_u = jax.lax.broadcasted_iota(jnp.int32, (tb_r, nu), 1)
    col_i = jax.lax.broadcasted_iota(jnp.int32, (tb_r, ni), 1)

    prods = []
    for q in range(p):                          # static tiny loop (P <= 8)
        hot_u = (col_u == u_idx[:, q:q + 1]).astype(user_tab.dtype)
        hot_i = (col_i == i_idx[:, q:q + 1]).astype(item_tab.dtype)
        # Exact gather (weights are exactly 0/1), f32 accumulation.
        ue = jnp.dot(hot_u, user_tab, preferred_element_type=jnp.float32)
        ie = jnp.dot(hot_i, item_tab, preferred_element_type=jnp.float32)
        prods.append(ue * ie)                   # (TB_R, D) f32

    out = prods[0] if p == 1 else jnp.concatenate(prods, axis=-1)
    out_ref[...] = out.astype(out_ref.dtype)


def gmf_forward(user_indices, item_indices, user_emb, item_emb, *,
                block_rows=512, compute_dtype=None):
    """GMF forward: (user_emb[user_idx] * item_emb[item_idx])."""
    B = int(user_indices.shape[0])
    num_users, D = user_emb.shape
    num_items, D2 = item_emb.shape
    assert D2 == D, "user/item embedding dims must match"
    out_dtype = user_emb.dtype                  # final store stays in f32

    # Optional lower-precision compute path (bf16 tables -> 3-4x faster MXU).
    if compute_dtype is not None:
        user_tab = user_emb.astype(compute_dtype)
        item_tab = item_emb.astype(compute_dtype)
    else:
        user_tab, item_tab = user_emb, item_emb

    # Lane-packing factor: P consecutive batch rows per 256-lane output row
    # (fully unmasked 2-vreg stores, matches the 256-wide MXU on v6e/v7x).
    if D < 256 and 256 % D == 0:
        P = 256 // D
    elif D < 128 and 128 % D == 0:
        P = 128 // D
    else:
        P = 1
    DP = P * D

    # Tile the packed-row axis.  TB_R is derived from the actual batch so the
    # tail padding stays below one tile; prefer >= 2 tiles when there is
    # enough work so the "parallel" axis can split across v7x's two TCs.
    rows_needed = max(1, pl.cdiv(B, P))
    n_tiles = pl.cdiv(rows_needed, block_rows)
    if n_tiles == 1 and rows_needed >= 16:
        n_tiles = 2
    tb_r = _round_up(pl.cdiv(rows_needed, n_tiles), 8)
    rows_padded = _round_up(rows_needed, tb_r)
    grid = (rows_padded // tb_r,)
    b_pad = rows_padded * P

    # Padded batch slots use index 0 (always valid); their gathered rows are
    # computed but discarded by the [:B] slice below.
    u_idx = jnp.pad(user_indices.astype(jnp.int32), (0, b_pad - B))
    i_idx = jnp.pad(item_indices.astype(jnp.int32), (0, b_pad - B))
    u_idx2 = u_idx.reshape(rows_padded, P)
    i_idx2 = i_idx.reshape(rows_padded, P)

    # Explicit VMEM budget: single-buffered resident tables + double-buffered
    # index / output tiles + live one-hot / product intermediates, with slack.
    tab_itemsize = jnp.dtype(user_tab.dtype).itemsize
    table_bytes = (num_users + num_items) * _round_up(D, 128) * tab_itemsize
    io_bytes = 2 * (tb_r * _round_up(DP, 128) * jnp.dtype(out_dtype).itemsize
                    + 2 * tb_r * 128 * 4)
    live_bytes = 4 * tb_r * _round_up(max(num_users, num_items), 128) * 4
    vmem_limit = int(min(max(2 * (table_bytes + io_bytes + live_bytes)
                             + (1 << 20), 16 << 20), 64 << 20))

    out_slab = pl.pallas_call(
        gmf_kernel,
        out_shape=jax.ShapeDtypeStruct((rows_padded, DP), out_dtype),
        grid=grid,
        in_specs=[
            pl.BlockSpec((tb_r, P), lambda t: (t, 0)),   # user index tile
            pl.BlockSpec((tb_r, P), lambda t: (t, 0)),   # item index tile
            # Whole tables resident in VMEM: one copy, no per-step re-fetch,
            # no double buffering.
            pl.BlockSpec(memory_space=pltpu.MemorySpace.VMEM),
            pl.BlockSpec(memory_space=pltpu.MemorySpace.VMEM),
        ],
        out_specs=pl.BlockSpec((tb_r, DP), lambda t: (t, 0)),
        compiler_params=pltpu.CompilerParams(
            dimension_semantics=(pltpu.PARALLEL,),
            vmem_limit_bytes=vmem_limit),
    )(u_idx2, i_idx2, user_tab, item_tab)

    # (rows_padded, P*D) lane-dense slab -> (B, D); reshape is a row-major view.
    return out_slab.reshape(b_pad, D)[:B]


if __name__ == "__main__":
    num_users, num_items, embedding_dim = 32, 48, 64
    batch = 8

    key = jax.random.PRNGKey(0)
    k_u, k_i, k_uw, k_iw = jax.random.split(key, 4)

    # nn.init.normal_(weight, std=0.01)
    user_emb = (0.01 * jax.random.normal(k_uw, (num_users, embedding_dim))).astype(jnp.float32)
    item_emb = (0.01 * jax.random.normal(k_iw, (num_items, embedding_dim))).astype(jnp.float32)

    user_indices = jax.random.randint(k_u, (batch,), 0, num_users, dtype=jnp.int32)
    item_indices = jax.random.randint(k_i, (batch,), 0, num_items, dtype=jnp.int32)

    # Reference: plain JAX gather + multiply.
    ref = user_emb[user_indices] * item_emb[item_indices]

    # f32 compute path (matches module semantics; 0/1 gather is exact).
    out = gmf_forward(user_indices, item_indices, user_emb, item_emb)
    out = jax.block_until_ready(out)
    np.testing.assert_allclose(np.asarray(out), np.asarray(ref), rtol=1e-5, atol=1e-6)

    # Optional bf16 compute path (per perf review: ~3-4x faster MXU gather
    # when the embeddings tolerate bf16 round-trip).
    out_bf16 = gmf_forward(user_indices, item_indices, user_emb, item_emb,
                           compute_dtype=jnp.bfloat16)
    out_bf16 = jax.block_until_ready(out_bf16)
    np.testing.assert_allclose(np.asarray(out_bf16), np.asarray(ref), rtol=2e-2, atol=1e-7)

    print("KERNEL_OK")
</pallas_src>

<mosaic_0001>
module attributes {stable_mosaic.version = 11 : i64} {
  func.func @gmf_kernel(%arg0: i32, %arg1: memref<8x4xi32, #tpu.memory_space<vmem>>, %arg2: memref<8x4xi32, #tpu.memory_space<vmem>>, %arg3: memref<32x64xf32, #tpu.memory_space<vmem>>, %arg4: memref<48x64xf32, #tpu.memory_space<vmem>>, %arg5: memref<8x256xf32, #tpu.memory_space<vmem>>) attributes {dimension_semantics = [#tpu.dimension_semantics<parallel>], iteration_bounds = array<i64: 1>, scalar_prefetch = 0 : i64, scratch_operands = 0 : i64, tpu.core_type = #tpu.core_type<tc>, window_params = [{transform_indices = @transform_0, window_bounds = array<i64: 8, 4>}, {transform_indices = @transform_1, window_bounds = array<i64: 8, 4>}, {pipeline_mode = #tpu.pipeline_mode<synchronous>, transform_indices = @transform_2, window_bounds = array<i64: 32, 64>}, {pipeline_mode = #tpu.pipeline_mode<synchronous>, transform_indices = @transform_3, window_bounds = array<i64: 48, 64>}, {transform_indices = @transform_4, window_bounds = array<i64: 8, 256>}]} {
    %c0 = arith.constant 0 : index
    %c0_0 = arith.constant 0 : index
    %0 = vector.load %arg1[%c0, %c0_0] : memref<8x4xi32, #tpu.memory_space<vmem>>, vector<8x4xi32>
    %c0_1 = arith.constant 0 : index
    %c0_2 = arith.constant 0 : index
    %1 = vector.load %arg2[%c0_1, %c0_2] : memref<8x4xi32, #tpu.memory_space<vmem>>, vector<8x4xi32>
    %c0_3 = arith.constant 0 : index
    %c0_4 = arith.constant 0 : index
    %2 = vector.load %arg3[%c0_3, %c0_4] : memref<32x64xf32, #tpu.memory_space<vmem>>, vector<32x64xf32>
    %c0_5 = arith.constant 0 : index
    %c0_6 = arith.constant 0 : index
    %3 = vector.load %arg4[%c0_5, %c0_6] : memref<48x64xf32, #tpu.memory_space<vmem>>, vector<48x64xf32>
    %4 = tpu.iota {dimensions = array<i32: 1>} : vector<8x32xi32>
    %5 = tpu.iota {dimensions = array<i32: 1>} : vector<8x48xi32>
    %6 = vector.extract_strided_slice %0 {offsets = [0, 0], sizes = [8, 1], strides = [1, 1]} : vector<8x4xi32> to vector<8x1xi32>
    %7 = vector.broadcast %6 : vector<8x1xi32> to vector<8x32xi32>
    %8 = arith.cmpi eq, %4, %7 : vector<8x32xi32>
    %9 = arith.extui %8 : vector<8x32xi1> to vector<8x32xi32>
    %10 = arith.sitofp %9 : vector<8x32xi32> to vector<8x32xf32>
    %11 = vector.extract_strided_slice %1 {offsets = [0, 0], sizes = [8, 1], strides = [1, 1]} : vector<8x4xi32> to vector<8x1xi32>
    %12 = vector.broadcast %11 : vector<8x1xi32> to vector<8x48xi32>
    %13 = arith.cmpi eq, %5, %12 : vector<8x48xi32>
    %14 = arith.extui %13 : vector<8x48xi1> to vector<8x48xi32>
    %15 = arith.sitofp %14 : vector<8x48xi32> to vector<8x48xf32>
    %cst = arith.constant dense<0.000000e+00> : vector<8x64xf32>
    %16 = tpu.matmul %10, %2, %cst {dimension_numbers = #tpu.dot_dimension_numbers<[1], [0], [0], [1], [0, 0, 1, 1], [], []>} : vector<8x32xf32>, vector<32x64xf32>, vector<8x64xf32> -> vector<8x64xf32>
    %cst_7 = arith.constant dense<0.000000e+00> : vector<8x64xf32>
    %17 = tpu.matmul %15, %3, %cst_7 {dimension_numbers = #tpu.dot_dimension_numbers<[1], [0], [0], [1], [0, 0, 1, 1], [], []>} : vector<8x48xf32>, vector<48x64xf32>, vector<8x64xf32> -> vector<8x64xf32>
    %18 = arith.mulf %16, %17 : vector<8x64xf32>
    %19 = vector.extract_strided_slice %0 {offsets = [0, 1], sizes = [8, 1], strides = [1, 1]} : vector<8x4xi32> to vector<8x1xi32>
    %20 = vector.broadcast %19 : vector<8x1xi32> to vector<8x32xi32>
    %21 = arith.cmpi eq, %4, %20 : vector<8x32xi32>
    %22 = arith.extui %21 : vector<8x32xi1> to vector<8x32xi32>
    %23 = arith.sitofp %22 : vector<8x32xi32> to vector<8x32xf32>
    %24 = vector.extract_strided_slice %1 {offsets = [0, 1], sizes = [8, 1], strides = [1, 1]} : vector<8x4xi32> to vector<8x1xi32>
    %25 = vector.broadcast %24 : vector<8x1xi32> to vector<8x48xi32>
    %26 = arith.cmpi eq, %5, %25 : vector<8x48xi32>
    %27 = arith.extui %26 : vector<8x48xi1> to vector<8x48xi32>
    %28 = arith.sitofp %27 : vector<8x48xi32> to vector<8x48xf32>
    %cst_8 = arith.constant dense<0.000000e+00> : vector<8x64xf32>
    %29 = tpu.matmul %23, %2, %cst_8 {dimension_numbers = #tpu.dot_dimension_numbers<[1], [0], [0], [1], [0, 0, 1, 1], [], []>} : vector<8x32xf32>, vector<32x64xf32>, vector<8x64xf32> -> vector<8x64xf32>
    %cst_9 = arith.constant dense<0.000000e+00> : vector<8x64xf32>
    %30 = tpu.matmul %28, %3, %cst_9 {dimension_numbers = #tpu.dot_dimension_numbers<[1], [0], [0], [1], [0, 0, 1, 1], [], []>} : vector<8x48xf32>, vector<48x64xf32>, vector<8x64xf32> -> vector<8x64xf32>
    %31 = arith.mulf %29, %30 : vector<8x64xf32>
    %32 = vector.extract_strided_slice %0 {offsets = [0, 2], sizes = [8, 1], strides = [1, 1]} : vector<8x4xi32> to vector<8x1xi32>
    %33 = vector.broadcast %32 : vector<8x1xi32> to vector<8x32xi32>
    %34 = arith.cmpi eq, %4, %33 : vector<8x32xi32>
    %35 = arith.extui %34 : vector<8x32xi1> to vector<8x32xi32>
    %36 = arith.sitofp %35 : vector<8x32xi32> to vector<8x32xf32>
    %37 = vector.extract_strided_slice %1 {offsets = [0, 2], sizes = [8, 1], strides = [1, 1]} : vector<8x4xi32> to vector<8x1xi32>
    %38 = vector.broadcast %37 : vector<8x1xi32> to vector<8x48xi32>
    %39 = arith.cmpi eq, %5, %38 : vector<8x48xi32>
    %40 = arith.extui %39 : vector<8x48xi1> to vector<8x48xi32>
    %41 = arith.sitofp %40 : vector<8x48xi32> to vector<8x48xf32>
    %cst_10 = arith.constant dense<0.000000e+00> : vector<8x64xf32>
    %42 = tpu.matmul %36, %2, %cst_10 {dimension_numbers = #tpu.dot_dimension_numbers<[1], [0], [0], [1], [0, 0, 1, 1], [], []>} : vector<8x32xf32>, vector<32x64xf32>, vector<8x64xf32> -> vector<8x64xf32>
    %cst_11 = arith.constant dense<0.000000e+00> : vector<8x64xf32>
    %43 = tpu.matmul %41, %3, %cst_11 {dimension_numbers = #tpu.dot_dimension_numbers<[1], [0], [0], [1], [0, 0, 1, 1], [], []>} : vector<8x48xf32>, vector<48x64xf32>, vector<8x64xf32> -> vector<8x64xf32>
    %44 = arith.mulf %42, %43 : vector<8x64xf32>
    %45 = vector.extract_strided_slice %0 {offsets = [0, 3], sizes = [8, 1], strides = [1, 1]} : vector<8x4xi32> to vector<8x1xi32>
    %46 = vector.broadcast %45 : vector<8x1xi32> to vector<8x32xi32>
    %47 = arith.cmpi eq, %4, %46 : vector<8x32xi32>
    %48 = arith.extui %47 : vector<8x32xi1> to vector<8x32xi32>
    %49 = arith.sitofp %48 : vector<8x32xi32> to vector<8x32xf32>
    %50 = vector.extract_strided_slice %1 {offsets = [0, 3], sizes = [8, 1], strides = [1, 1]} : vector<8x4xi32> to vector<8x1xi32>
    %51 = vector.broadcast %50 : vector<8x1xi32> to vector<8x48xi32>
    %52 = arith.cmpi eq, %5, %51 : vector<8x48xi32>
    %53 = arith.extui %52 : vector<8x48xi1> to vector<8x48xi32>
    %54 = arith.sitofp %53 : vector<8x48xi32> to vector<8x48xf32>
    %cst_12 = arith.constant dense<0.000000e+00> : vector<8x64xf32>
    %55 = tpu.matmul %49, %2, %cst_12 {dimension_numbers = #tpu.dot_dimension_numbers<[1], [0], [0], [1], [0, 0, 1, 1], [], []>} : vector<8x32xf32>, vector<32x64xf32>, vector<8x64xf32> -> vector<8x64xf32>
    %cst_13 = arith.constant dense<0.000000e+00> : vector<8x64xf32>
    %56 = tpu.matmul %54, %3, %cst_13 {dimension_numbers = #tpu.dot_dimension_numbers<[1], [0], [0], [1], [0, 0, 1, 1], [], []>} : vector<8x48xf32>, vector<48x64xf32>, vector<8x64xf32> -> vector<8x64xf32>
    %57 = arith.mulf %55, %56 : vector<8x64xf32>
    %58 = tpu.concatenate %18, %31, %44, %57 in 1 : vector<8x64xf32>, vector<8x64xf32>, vector<8x64xf32>, vector<8x64xf32> -> vector<8x256xf32>
    %c0_14 = arith.constant 0 : index
    %c0_15 = arith.constant 0 : index
    %59 = vector.load %arg5[%c0_14, %c0_15] : memref<8x256xf32, #tpu.memory_space<vmem>>, vector<8x256xf32>
    tpu.vector_store %arg5[%c0_14, %c0_15], %58 {strides = array<i32>} : memref<8x256xf32, #tpu.memory_space<vmem>>, vector<8x256xf32>,
    return
  }
  func.func @transform_0(%arg0: i32) -> (i32, i32) {
    %c0_i32 = arith.constant 0 : i32
    %c0_i32_0 = arith.constant 0 : i32
    return %arg0, %c0_i32 : i32, i32
  }
  func.func @transform_1(%arg0: i32) -> (i32, i32) {
    %c0_i32 = arith.constant 0 : i32
    %c0_i32_0 = arith.constant 0 : i32
    return %arg0, %c0_i32 : i32, i32
  }
  func.func @transform_2(%arg0: i32) -> (i32, i32) {
    %c0_i32 = arith.constant 0 : i32
    %c0_i32_0 = arith.constant 0 : i32
    %c0_i32_1 = arith.constant 0 : i32
    return %c0_i32, %c0_i32_0 : i32, i32
  }
  func.func @transform_3(%arg0: i32) -> (i32, i32) {
    %c0_i32 = arith.constant 0 : i32
    %c0_i32_0 = arith.constant 0 : i32
    %c0_i32_1 = arith.constant 0 : i32
    return %c0_i32, %c0_i32_0 : i32, i32
  }
  func.func @transform_4(%arg0: i32) -> (i32, i32) {
    %c0_i32 = arith.constant 0 : i32
    %c0_i32_0 = arith.constant 0 : i32
    return %arg0, %c0_i32 : i32, i32
  }
}

</mosaic_0001>

<bundles_post_ra>
// kernel: tpu_custom_call.1
= control target key start
LH: loop header
LB: loop body
LE: loop exit
PB: predicated region body
PF: predicated region fallthrough
CT: control target
= control target key end

     0   :  { %9 = vsyncpa [#allocation3], 0  ;;  %s1174_s0 = inlined_call_operand.vmem [shape: s32[8,4], index: 0, kind: input, shape index: {}]   ;;  %s1175_s1 = inlined_call_operand.vmem [shape: s32[8,4], index: 1, kind: input, shape index: {}]   ;;  %s1176_s2 = inlined_call_operand.hbm [shape: f32[32,64], index: 2, kind: input, shape index: {}]   ;;  %s1177_s3 = inlined_call_operand.hbm [shape: f32[48,64], index: 3, kind: input, shape index: {}]   ;;  %s1178_s4 = inlined_call_operand.hbm [shape: f32[8,256], index: 4, kind: output, shape index: {}]  }
   0x1   :  { %10 = vsyncpa [#allocation6], 0 }
   0x2   :  { %11 = vsyncpa [#allocation4], 0  ;;  %s980_s15 = smov [#allocation2]  }
   0x3   :  { %s21_s16 = sshll.u32 %s980_s15, 4  ;;  %s22_s16 = int_to_ptr.vmem [resolvable:$true] %s21_s16 }
   0x4   :  { %s922_s17 = scalar_lea.vmem %s22_s16, 512  ;;  %p927_p1 = scmp.lt.s32.totalorder %s22_s16, %s22_s16 }
   0x5   :  { %p923_p0 = scmp.ne.s32.totalorder %s22_s16, %s922_s17  ;;  %p928_p2 = scmp.lt.s32.totalorder %s922_s17, %s922_s17 }
   0x7   :  { %p929_p3 = por %p928_p2, %p927_p1 }
   0x9   :  { %p930_p4 = pnand %p929_p3, %p923_p0 }
   0xb   :  { %933 = shalt.err (!%p930_p4)
}
   0xc   :  { %s981_s18 = smov 128   ;;  %s982_s19 = smov 8  }
   0xd   :  { %27 = dma.hbm_to_vmem [thread:$0]  %s1176_s2, 512, %s22_s16, [#allocation3], %s981_s18, %s981_s18, %s982_s19  }
   0xe   :  { %s983_s22 = smov [#allocation5]  }
   0xf   :  { %s33_s23 = sshll.u32 %s983_s22, 4  ;;  %s34_s23 = int_to_ptr.vmem [resolvable:$true] %s33_s23 }
  0x10   :  { %s942_s24 = scalar_lea.vmem %s34_s23, 768  ;;  %p947_p6 = scmp.lt.s32.totalorder %s34_s23, %s34_s23 }
  0x11   :  { %p943_p5 = scmp.ne.s32.totalorder %s34_s23, %s942_s24  ;;  %p948_p7 = scmp.lt.s32.totalorder %s942_s24, %s942_s24 }
  0x13   :  { %p949_p8 = por %p948_p7, %p947_p6 }
  0x15   :  { %p950_p9 = pnand %p949_p8, %p943_p5 }
  0x17   :  { %953 = shalt.err (!%p950_p9)
}
  0x18   :  { %39 = dma.hbm_to_vmem [thread:$0]  %s1177_s3, 768, %s34_s23, [#allocation6], %s981_s18, %s981_s18, %s982_s19  }
  0x19   :  { %974 = dma.done.wait [#allocation3], 512  }
  0x1a   :  { %975 = vsyncadd [#allocation3], 4294966784 }
  0x1b   :  { %976 = dma.done.wait [#allocation6], 768  }
  0x1c   :  { %977 = vsyncadd [#allocation6], 4294966528  ;;  %v984_v0 = vmov 3   ;;  %v985_v1 = vmov 0   ;;  %v986_v2 = vmov 0.0   ;;  %vm987_vm0 = vmmov 0  }
  0x1d   :  { %909 = vset.pattern.permute.xlu1 %v984_v0  ;;  %907 = vset.pattern.permute.xlu0 %v985_v1  ;;  %v47_v3 = vld [vmem:[%s1175_s1] sm:$0xff]  ;;  %v1035_v5 = vld [vmem:[#allocation5 + $0x28] sm:$0xff]  ;;  %v1040_v7 = vld [vmem:[#allocation2 + $0x18] sm:$0xff]  ;;  %v988_v9 = vmov 1   ;;  %v989_v16 = vmov 2   ;;  %v58_v17 = vlaneseq  ;;  %vm146_vm1 = vcmask 392192  }
  0x1e   :  { %802 = vmatprep.subr.mxu1 %v986_v2  ;;  %791 = vmatprep.subr.mxu0 %v986_v2  ;;  %v46_v4 = vld [vmem:[%s1174_s0] sm:$0xff]  ;;  %v1046_v8 = vld [vmem:[#allocation2 + $0x10] sm:$0xff]  ;;  %v1048_v10 = vld [vmem:[#allocation5 + $0x18] sm:$0xff]  ;;  %vm72_vm3 = vcmask 261120   ;;  %s990_s0 = smov 64   ;;  %vm706_vm11 = vcmask 523264  }
  0x1f   :  { %814 = vmatprep.mubr.msk.f32.mxu1 %vm987_vm0, %v986_v2  ;;  %799 = vmatprep.mubr.msk.f32.mxu0 %vm987_vm0, %v986_v2  ;;  %v1037_v6 = vld [vmem:[#allocation5 + $0x20] sm:$0xff]  ;;  %v1050_v11 = vld [vmem:[#allocation2 + $0x8] sm:$0xff]  ;;  %v1057_v12 = vld [vmem:[#allocation5 + $0x10] sm:$0xff]  ;;  %v1075_v18 = vand.u32 127, %v58_v17  ;;  %s991_s1 = smov [#allocation7]  }
  0x20   :  { %67 = vperm.xlu0 %907, %v47_v3   ;;  %540 = vperm.xlu1 %909, %v46_v4   ;;  %v1060_v13 = vld [vmem:[#allocation2] sm:$0xff]  ;;  %v1062_v14 = vld [vmem:[#allocation5 + $0x8] sm:$0xff]  ;;  %s717_s29 = sshll.u32 %s991_s1, 4  ;;  %s718_s29 = int_to_ptr.vmem [resolvable:$true] %s717_s29 }
  0x21   :  { %803 = vmatpush3.msra.mxu1 %v1035_v5  ;;  %792 = vmatpush3.msra.mxu0 %v1040_v7  ;;  %v1067_v15 = vld [vmem:[#allocation5] sm:$0xff]  ;;  %s954_s30 = scalar_lea.vmem %s718_s29, 256  ;;  %p959_p11 = scmp.lt.s32.totalorder %s718_s29, %s718_s29 }
  0x22   :  { %804 = vmatprep.subr.mxu1 %v986_v2  ;;  %793 = vmatprep.subr.mxu0 %v986_v2  ;;  %p955_p10 = scmp.ne.s32.totalorder %s718_s29, %s954_s30  ;;  %p960_p12 = scmp.lt.s32.totalorder %s954_s30, %s954_s30 }
  0x23   :  { %805 = vmatpush3.msra.mxu1 %v1037_v6  ;;  %794 = vmatpush3.msra.mxu0 %v1046_v8 }
  0x24   :  { %910 = vset.pattern.permute.xlu1 %v985_v1  ;;  %908 = vset.pattern.permute.xlu0 %v988_v9  ;;  %p961_p13 = por %p960_p12, %p959_p11 }
  0x25   :  { %61 = vperm.xlu1 %910, %v46_v4   ;;  %228 = vperm.xlu0 %908, %v47_v3  }
  0x26   :  { %806 = vmatprep.subr.mxu1 %v986_v2  ;;  %795 = vmatprep.subr.mxu0 %v986_v2  ;;  %p962_p0 = pnand %p961_p13, %p955_p10 }
  0x27   :  { %807 = vmatpush3.msra.mxu1 %v1048_v10  ;;  %796 = vmatpush3.msra.mxu0 %v1050_v11 }
  0x28   :  { %808 = vmatprep.subr.mxu1 %v986_v2  ;;  %797 = vmatprep.subr.mxu0 %v986_v2 }
  0x29   :  { %911 = vset.pattern.permute.xlu1 %v988_v9  ;;  %912 = vset.pattern.permute.xlu0 %v984_v0 }
  0x2a   :  { %222 = vperm.xlu1 %911, %v46_v4   ;;  %546 = vperm.xlu0 %912, %v47_v3  }
  0x2b   :  { %809 = vmatpush3.msra.mxu1 %v1057_v12  ;;  %798 = vmatpush3.msra.mxu0 %v1060_v13 }
  0x2c   :  { %810 = vmatprep.subr.mxu1 %v986_v2  ;;  %817 = vmatprep.subr.mxu0 %v986_v2 }
  0x2d   :  { %811 = vmatpush3.msra.mxu1 %v1062_v14 }
  0x2e   :  { %913 = vset.pattern.permute.xlu1 %v989_v16  ;;  %812 = vmatprep.subr.mxu1 %v986_v2 }
  0x2f   :  { %381 = vperm.xlu1 %913, %v46_v4   ;;  %813 = vmatpush3.msra.mxu1 %v1067_v15 }
  0x30   :  { %828 = vmatprep.subr.mxu1 %v986_v2 }
  0x33   :  { %387 = vperm.xlu1 %913, %v47_v3  }
  0x9b   :  { %v68_v19 = vpop.permute.xlu0 %67  ;;  %v541_v20 = vpop.permute.xlu1 %540 }
  0x9c   :  { %vm69_vm2 = vcmp.eq.s32.totalorder %v1075_v18, %v68_v19  ;;  %vm542_vm7 = vcmp.eq.s32.totalorder %v1075_v18, %v541_v20 }
  0x9d   :  { %v728_v21 = vsel %vm69_vm2, 1.0, %v986_v2  ;;  %v739_v28 = vsel %vm542_vm7, 1.0, %v986_v2 }
  0x9e   :  { %815 = vmatmul.mubr.msk.f32.vlgmr.msra.gmra.mxu1 %vm146_vm1, %v728_v21 }
  0x9f   :  { %829 = vmatpush3.msra.mxu1 %v1035_v5  ;;  %840 = vmatprep.mubr.msk.f32.mxu1 %vm987_vm0, %v986_v2 }
  0xa0   :  { %830 = vmatprep.subr.mxu1 %v986_v2  ;;  %v62_v22 = vpop.permute.xlu1 %61  ;;  %v229_v24 = vpop.permute.xlu0 %228 }
  0xa1   :  { %831 = vmatpush3.msra.mxu1 %v1037_v6  ;;  %vm63_vm4 = vcmp.eq.s32.totalorder %v1075_v18, %v62_v22  ;;  %vm230_vm5 = vcmp.eq.s32.totalorder %v1075_v18, %v229_v24 }
  0xa2   :  { %v727_v23 = vsel %vm63_vm4, 1.0, %v986_v2  ;;  %832 = vmatprep.subr.mxu1 %v986_v2  ;;  %v732_v26 = vsel %vm230_vm5, 1.0, %v986_v2 }
  0xa3   :  { %833 = vmatpush3.msra.mxu1 %v1048_v10  ;;  %800 = vmatmul.mubr.msk.f32.vlgmr.msra.gmra.mxu0 %vm72_vm3, %v727_v23 }
  0xa4   :  { %818 = vmatpush3.msra.mxu0 %v1040_v7  ;;  %834 = vmatprep.subr.mxu1 %v986_v2 }
  0xa5   :  { %819 = vmatprep.subr.mxu0 %v986_v2  ;;  %835 = vmatpush3.msra.mxu1 %v1057_v12  ;;  %v223_v25 = vpop.permute.xlu1 %222  ;;  %v547_v30 = vpop.permute.xlu0 %546 }
  0xa6   :  { %836 = vmatprep.subr.mxu1 %v986_v2  ;;  %820 = vmatpush3.msra.mxu0 %v1046_v8  ;;  %vm224_vm6 = vcmp.eq.s32.totalorder %v1075_v18, %v223_v25  ;;  %vm548_vm9 = vcmp.eq.s32.totalorder %v1075_v18, %v547_v30 }
  0xa7   :  { %837 = vmatpush3.msra.mxu1 %v1062_v14  ;;  %821 = vmatprep.subr.mxu0 %v986_v2  ;;  %v731_v27 = vsel %vm224_vm6, 1.0, %v986_v2  ;;  %v740_v32 = vsel %vm548_vm9, 1.0, %v986_v2 }
  0xa8   :  { %822 = vmatpush3.msra.mxu0 %v1050_v11  ;;  %838 = vmatprep.subr.mxu1 %v986_v2 }
  0xa9   :  { %823 = vmatprep.subr.mxu0 %v986_v2  ;;  %839 = vmatpush3.msra.mxu1 %v1067_v15 }
  0xaa   :  { %824 = vmatpush3.msra.mxu0 %v1060_v13  ;;  %825 = vmatprep.mubr.msk.f32.mxu0 %vm987_vm0, %v986_v2  ;;  %v382_v29 = vpop.permute.xlu1 %381 }
  0xab   :  { %841 = vmatmul.mubr.msk.f32.vlgmr.msra.gmra.mxu1 %vm146_vm1, %v732_v26  ;;  %869 = vmatprep.subr.mxu1 %v986_v2  ;;  %vm383_vm8 = vcmp.eq.s32.totalorder %v1075_v18, %v382_v29 }
  0xac   :  { %826 = vmatmul.mubr.msk.f32.vlgmr.msra.gmra.mxu0 %vm72_vm3, %v731_v27  ;;  %870 = vmatpush3.msra.mxu1 %v1040_v7  ;;  %v735_v31 = vsel %vm383_vm8, 1.0, %v986_v2 }
  0xad   :  { %871 = vmatprep.subr.mxu1 %v986_v2  ;;  %877 = vmatprep.mubr.msk.f32.mxu1 %vm987_vm0, %v986_v2 }
  0xae   :  { %872 = vmatpush3.msra.mxu1 %v1046_v8  ;;  %843 = vmatprep.subr.mxu0 %v986_v2  ;;  %v388_v33 = vpop.permute.xlu1 %387 }
  0xaf   :  { %873 = vmatprep.subr.mxu1 %v986_v2  ;;  %844 = vmatpush3.msra.mxu0 %v1040_v7  ;;  %vm389_vm10 = vcmp.eq.s32.totalorder %v1075_v18, %v388_v33 }
  0xb0   :  { %874 = vmatpush3.msra.mxu1 %v1050_v11  ;;  %845 = vmatprep.subr.mxu0 %v986_v2  ;;  %v736_v34 = vsel %vm389_vm10, 1.0, %v986_v2 }
  0xb1   :  { %875 = vmatprep.subr.mxu1 %v986_v2  ;;  %846 = vmatpush3.msra.mxu0 %v1046_v8 }
  0xb2   :  { %876 = vmatpush3.msra.mxu1 %v1060_v13  ;;  %847 = vmatprep.subr.mxu0 %v986_v2 }
  0xb3   :  { %878 = vmatmul.mubr.msk.f32.vlgmr.msra.gmra.mxu1 %vm72_vm3, %v739_v28  ;;  %880 = vmatprep.subr.mxu1 %v986_v2 }
  0xb4   :  { %881 = vmatpush3.msra.mxu1 %v1035_v5  ;;  %892 = vmatprep.mubr.msk.f32.mxu1 %vm987_vm0, %v986_v2 }
  0xb5   :  { %882 = vmatprep.subr.mxu1 %v986_v2  ;;  %848 = vmatpush3.msra.mxu0 %v1050_v11 }
  0xb6   :  { %883 = vmatpush3.msra.mxu1 %v1037_v6  ;;  %849 = vmatprep.subr.mxu0 %v986_v2 }
  0xb7   :  { %884 = vmatprep.subr.mxu1 %v986_v2  ;;  %850 = vmatpush3.msra.mxu0 %v1060_v13 }
  0xb8   :  { %885 = vmatpush3.msra.mxu1 %v1048_v10  ;;  %851 = vmatprep.mubr.msk.f32.mxu0 %vm987_vm0, %v986_v2 }
  0xb9   :  { %886 = vmatprep.subr.mxu1 %v986_v2  ;;  %854 = vmatprep.subr.mxu0 %v986_v2 }
  0xba   :  { %887 = vmatpush3.msra.mxu1 %v1057_v12  ;;  %852 = vmatmul.mubr.msk.f32.vlgmr.msra.gmra.mxu0 %vm72_vm3, %v735_v31 }
  0xbb   :  { %888 = vmatprep.subr.mxu1 %v986_v2  ;;  %855 = vmatpush3.msra.mxu0 %v1035_v5 }
  0xbc   :  { %889 = vmatpush3.msra.mxu1 %v1062_v14  ;;  %856 = vmatprep.subr.mxu0 %v986_v2 }
  0xbd   :  { %890 = vmatprep.subr.mxu1 %v986_v2  ;;  %857 = vmatpush3.msra.mxu0 %v1037_v6 }
  0xbe   :  { %891 = vmatpush3.msra.mxu1 %v1067_v15  ;;  %858 = vmatprep.subr.mxu0 %v986_v2 }
  0xbf   :  { %893 = vmatmul.mubr.msk.f32.vlgmr.msra.gmra.mxu1 %vm146_vm1, %v740_v32  ;;  %859 = vmatpush3.msra.mxu0 %v1048_v10 }
  0xc0   :  { %860 = vmatprep.subr.mxu0 %v986_v2  ;;  %866 = vmatprep.mubr.msk.f32.mxu0 %vm987_vm0, %v986_v2 }
  0xc1   :  { %861 = vmatpush3.msra.mxu0 %v1057_v12 }
  0xc2   :  { %862 = vmatprep.subr.mxu0 %v986_v2 }
  0xc3   :  { %863 = vmatpush3.msra.mxu0 %v1062_v14 }
  0xc4   :  { %864 = vmatprep.subr.mxu0 %v986_v2 }
  0xc5   :  { %865 = vmatpush3.msra.mxu0 %v1067_v15 }
  0xc6   :  { %867 = vmatmul.mubr.msk.f32.vlgmr.msra.gmra.mxu0 %vm146_vm1, %v736_v34 }
 0x15e   :  { %v216_v35 = vpop.f32.mrf.mxu1 }
 0x160   :  { %v816_v36 = vpop.f32.mrf.mxu1 }
 0x163   :  { %v142_v37 = vpop.f32.mrf.mxu0 }
 0x164   :  { %v220_v38 = vmul.f32 %v216_v35, %v142_v37 }
 0x165   :  { %v801_v39 = vpop.f32.mrf.mxu0 }
 0x16b   :  { %v375_v40 = vpop.f32.mrf.mxu1 }
 0x16c   :  { %v302_v41 = vpop.f32.mrf.mxu0 }
 0x16d   :  { %v379_v42 = vmul.f32 %v375_v40, %v302_v41  ;;  %v842_v43 = vpop.f32.mrf.mxu1 }
 0x16e   :  { %v827_v44 = vpop.f32.mrf.mxu0 }
 0x16f   :  { %699 = vrot.lane.b32.xlu0 %v379_v42, %s990_s0 }
 0x173   :  { %v620_v45 = vpop.f32.mrf.mxu1 }
 0x175   :  { %v879_v46 = vpop.f32.mrf.mxu1 }
 0x17a   :  { %v461_v47 = vpop.f32.mrf.mxu0 }
 0x17c   :  { %v853_v48 = vpop.f32.mrf.mxu0 }
 0x17f   :  { %v693_v49 = vpop.f32.mrf.mxu1 }
 0x180   :  { %v697_v50 = vmul.f32 %v693_v49, %v620_v45 }
 0x181   :  { %v894_v51 = vpop.f32.mrf.mxu1 }
 0x182   :  { %703 = vrot.lane.b32.xlu1 %v697_v50, %s990_s0 }
 0x186   :  { %v534_v52 = vpop.f32.mrf.mxu0 }
 0x187   :  { %v538_v53 = vmul.f32 %v534_v52, %v461_v47 }
 0x188   :  { %v868_v54 = vpop.f32.mrf.mxu0 }
 0x1e1   :  { %v700_v55 = vpop.permute.xlu0 %699 }
 0x1e2   :  { %v707_v56 = vsel %vm706_vm11, %v220_v38, %v700_v55 }
 0x1e3   :  { %709 = vst [vmem:[#allocation7] sm:$0xff] %v707_v56 }
 0x1f4   :  { %v704_v57 = vpop.permute.xlu1 %703 }
 0x1f5   :  { %v708_v58 = vsel %vm706_vm11, %v538_v53, %v704_v57 }
 0x1f6   :  { %710 = vst [vmem:[#allocation7 + $0x8] sm:$0xff] %v708_v58 }
 0x1f7   :  { %965 = shalt.err (!%p962_p0)
}
 0x1f8   :  { %720 = dma.vmem_to_hbm [thread:$0]  %s718_s29, 256, %s1178_s4, [#allocation4]  }
 0x1f9   :  { %978 = dma.done.wait [#allocation4], 256  }
 0x1fa   :  { %979 = vsyncadd [#allocation4], 4294967040 }
 0x1fb   :  { %724 = vsyncpa [#allocation3], 1 }
 0x1fc   :  { %725 = vsyncpa [#allocation6], 1 }
 0x1fd   :  { %726 = vsyncpa [#allocation4], 1 }

</bundles_post_ra>
